<compile_context>
chip_gen: v7x
topology: tpu7x:2x2x1
jax: 0.10.0
libtpu: 0.0.40
codegen_flags: <defaults>
</compile_context>

<pallas_src>
import functools
import math

import numpy as np
import jax
import jax.numpy as jnp
from jax import lax
from jax.experimental import pallas as pl
from jax.experimental.pallas import tpu as pltpu


# ----------------------------------------------------------------------------
# VMEM budget / tile selection helpers
# ----------------------------------------------------------------------------
def _vmem_capacity_bytes():
    try:
        cap = getattr(pltpu.get_tpu_info(), "vmem_capacity_bytes", None)
        if cap:
            return int(cap)
    except Exception:
        pass
    return 64 * 1024 * 1024            # v7x per-TensorCore VMEM: safe floor on all gens


_VMEM_CAP = _vmem_capacity_bytes()
_VMEM_LIMIT = (_VMEM_CAP * 3) // 4     # explicit scoped-VMEM limit handed to the compiler
_TILE_BUDGET = _VMEM_CAP // 3          # conservative per-step working-set budget


def _round_up(x, m):
    return ((x + m - 1) // m) * m


def _choose_tile(P, C, M):
    """Largest lane tile T (multiple of 128, divisor of padded P) that fits the VMEM
    budget, keeping the grid length >= 2 so both v7x TensorCores get work."""
    P_pad = _round_up(P, 128)
    n = P_pad // 128
    best = 1
    for d in range(1, n + 1):
        if n % d:
            continue
        T = 128 * d
        # double-buffered pipeline windows + in-kernel f32 temporaries (conservative)
        est = 4 * C * T * (3 * M + 10)
        if est > _TILE_BUDGET:
            continue
        if n >= 2 and n // d < 2:
            continue                   # keep >= 2 grid steps (megacore / pipelining)
        best = d
    T = 128 * best
    return P_pad, T, P_pad // T


def _pad_lanes(a, P_pad):
    P = a.shape[-1]
    if P == P_pad:
        return a
    pad = [(0, 0)] * (a.ndim - 1) + [(0, P_pad - P)]
    return jnp.pad(a, pad)


def _compiler_params():
    return pltpu.CompilerParams(dimension_semantics=("parallel",),
                                vmem_limit_bytes=_VMEM_LIMIT)


# ----------------------------------------------------------------------------
# In-kernel softmax over a list of (1, T) score rows (no concat / sublane slicing)
# ----------------------------------------------------------------------------
def _softmax_weights(scores):
    s_max = scores[0]
    for s in scores[1:]:
        s_max = jnp.maximum(s_max, s)
    ps = [jnp.exp(s - s_max) for s in scores]
    denom = ps[0]
    for p in ps[1:]:
        denom = denom + p
    inv = pl.reciprocal(denom, approx=True)      # EUP slot; one Newton step for accuracy
    inv = inv * (2.0 - denom * inv)
    return [p * inv for p in ps]


# ----------------------------------------------------------------------------
# Kernel 1: homogeneous branch — single ego query over M keys/values of dim C.
# ----------------------------------------------------------------------------
def _ego_attn_kernel(q_ref, kv_ref, o_ref, *, scale, M):
    q = q_ref[...].astype(jnp.float32) * scale                     # scale folded once
    scores = [jnp.sum(q * kv_ref[m].astype(jnp.float32), axis=0, keepdims=True)
              for m in range(M)]                                   # M x (1, T)
    w = _softmax_weights(scores)
    acc = kv_ref[0].astype(jnp.float32) * w[0]
    for m in range(1, M):
        acc = acc + kv_ref[m].astype(jnp.float32) * w[m]
    o_ref[...] = acc.astype(o_ref.dtype)


def ego_attention_pallas(q, kv, scale):
    """q: (C, P) single query per pixel; kv: (M, C, P); returns (C, P) in q.dtype."""
    C, P = q.shape
    M = kv.shape[0]
    P_pad, T, n_steps = _choose_tile(P, C, M)
    out = pl.pallas_call(
        functools.partial(_ego_attn_kernel, scale=float(scale), M=M),
        out_shape=jax.ShapeDtypeStruct((C, P_pad), q.dtype),
        grid_spec=pltpu.PrefetchScalarGridSpec(
            num_scalar_prefetch=0,
            grid=(n_steps,),
            in_specs=[pl.BlockSpec((C, T), lambda i: (0, i)),
                      pl.BlockSpec((M, C, T), lambda i: (0, 0, i))],
            out_specs=pl.BlockSpec((C, T), lambda i: (0, i)),
        ),
        compiler_params=_compiler_params(),
    )(_pad_lanes(q, P_pad), _pad_lanes(kv, P_pad))
    return out[:, :P] if P_pad != P else out


# ----------------------------------------------------------------------------
# Kernel 2: heterogeneous branch — lidar query over the 9 (C,H)-rolled camera
# variants.  Only the 3 H-rolls are read from HBM; the +/-1 channel rolls are
# applied on-chip via (C, C) permutation matmuls (idle MXU).
#
#   score(xo, iy) = sum_c q[(c+xo)%C] * cam_h[iy][c]           (= dot(roll(q,-xo), cam))
#   out           = sum_xo roll_C( sum_iy w[xo,iy]*cam_h[iy], xo )
# ----------------------------------------------------------------------------
def _hetero_attn_kernel(q_ref, cam_ref, o_ref, *, scale):
    f32 = jnp.float32
    C = q_ref.shape[0]
    q0 = q_ref[...].astype(f32) * scale                            # (C, T)

    # (C, C) channel-roll permutation matrices built on-chip (iota + compares, no HBM).
    r = lax.broadcasted_iota(jnp.int32, (C, C), 0)
    c = lax.broadcasted_iota(jnp.int32, (C, C), 1)
    d = r - c
    roll_p1 = ((d == 1) | (d == 1 - C)).astype(f32)                # roll(v, +1) = roll_p1 @ v
    roll_m1 = ((d == -1) | (d == C - 1)).astype(f32)               # roll(v, -1) = roll_m1 @ v

    cams = [cam_ref[iy].astype(f32) for iy in range(3)]            # 3 H-rolled copies (C, T)

    q_by_xo = (jnp.dot(roll_p1, q0, preferred_element_type=f32),   # xo = -1 -> roll(q, +1)
               q0,                                                 # xo =  0
               jnp.dot(roll_m1, q0, preferred_element_type=f32))   # xo = +1 -> roll(q, -1)

    scores = [jnp.sum(qx * cam, axis=0, keepdims=True)
              for qx in q_by_xo for cam in cams]                   # 9 x (1, T)
    w = _softmax_weights(scores)

    out = jnp.zeros_like(q0)
    idx = 0
    for xo in (-1, 0, 1):
        acc = cams[0] * w[idx]
        idx += 1
        for iy in (1, 2):
            acc = acc + cams[iy] * w[idx]
            idx += 1
        if xo == -1:
            acc = jnp.dot(roll_m1, acc, preferred_element_type=f32)
        elif xo == 1:
            acc = jnp.dot(roll_p1, acc, preferred_element_type=f32)
        out = out + acc
    o_ref[...] = out.astype(o_ref.dtype)


def hetero_attention_pallas(q, camera_feature, scale):
    """q: (C, H*W) lidar query; camera_feature: (C, H, W).  Returns (C, H*W)."""
    C, H, W = camera_feature.shape
    P = H * W
    # Only the 3 H-rolls (yo = -1, 0, +1) are materialized; channel rolls happen in-kernel.
    cam_h = jnp.stack([jnp.roll(camera_feature, yo, axis=1) for yo in (-1, 0, 1)], axis=0)
    cam_h = cam_h.reshape(3, C, P)
    P_pad, T, n_steps = _choose_tile(P, C, 9)
    out = pl.pallas_call(
        functools.partial(_hetero_attn_kernel, scale=float(scale)),
        out_shape=jax.ShapeDtypeStruct((C, P_pad), q.dtype),
        grid_spec=pltpu.PrefetchScalarGridSpec(
            num_scalar_prefetch=0,
            grid=(n_steps,),
            in_specs=[pl.BlockSpec((C, T), lambda i: (0, i)),
                      pl.BlockSpec((3, C, T), lambda i: (0, 0, i))],
            out_specs=pl.BlockSpec((C, T), lambda i: (0, i)),
        ),
        compiler_params=_compiler_params(),
    )(_pad_lanes(q, P_pad), _pad_lanes(cam_h, P_pad))
    return out[:, :P] if P_pad != P else out


# ----------------------------------------------------------------------------
# Pure-JAX references (used for correctness checks only)
# ----------------------------------------------------------------------------
def ego_attention_ref(q, kv, scale):
    s = jnp.einsum("cp,mcp->mp", q, kv, precision=lax.Precision.HIGHEST) * scale
    attn = jax.nn.softmax(s, axis=0)
    return jnp.einsum("mp,mcp->cp", attn, kv, precision=lax.Precision.HIGHEST)


def hetero_attention_ref(q, camera_feature, scale):
    C, H, W = camera_feature.shape
    # Literal torch.roll over dims (0, 1) = (C, H) of the (C, H, W) tensor.
    rolls = [jnp.roll(camera_feature, (xo, yo), axis=(0, 1))
             for xo in (-1, 0, 1) for yo in (-1, 0, 1)]
    kv = jnp.stack(rolls, axis=0).reshape(9, C, H * W)
    return ego_attention_ref(q, kv, scale)


# ----------------------------------------------------------------------------
# Plain-JAX glue: warp_affine_simple (affine_grid + bilinear grid_sample).
# TODO(synk): the data-dependent bilinear gather stays in plain JAX; it has no
# clean blocked Pallas mapping at these sizes.
# ----------------------------------------------------------------------------
def warp_affine_simple(src, M, dsize):
    """src: (N, C, H, W), M: (N, 2, 3) normalized affine; bilinear, zero pad,
    align_corners=False (torch defaults used in opencood)."""
    N, C, H, W = src.shape
    Hd, Wd = dsize
    xs = (2.0 * (jnp.arange(Wd, dtype=jnp.float32) + 0.5) / Wd) - 1.0
    ys = (2.0 * (jnp.arange(Hd, dtype=jnp.float32) + 0.5) / Hd) - 1.0
    gx, gy = jnp.meshgrid(xs, ys)                                  # (Hd, Wd)
    base = jnp.stack([gx, gy, jnp.ones_like(gx)], axis=-1)         # (Hd, Wd, 3)
    grid = jnp.einsum("nij,hwj->nhwi", M.astype(jnp.float32), base)
    x = ((grid[..., 0] + 1.0) * W - 1.0) / 2.0
    y = ((grid[..., 1] + 1.0) * H - 1.0) / 2.0
    x0 = jnp.floor(x)
    y0 = jnp.floor(y)
    wx1 = x - x0
    wx0 = 1.0 - wx1
    wy1 = y - y0
    wy0 = 1.0 - wy1

    flat = src.reshape(N, C, H * W)

    def gather(ix, iy):
        valid = (ix >= 0) & (ix <= W - 1) & (iy >= 0) & (iy <= H - 1)
        ixc = jnp.clip(ix, 0, W - 1).astype(jnp.int32)
        iyc = jnp.clip(iy, 0, H - 1).astype(jnp.int32)
        idx = (iyc * W + ixc).reshape(N, 1, Hd * Wd)
        idx = jnp.broadcast_to(idx, (N, C, Hd * Wd))
        g = jnp.take_along_axis(flat, idx, axis=2).reshape(N, C, Hd, Wd)
        return g * valid.reshape(N, 1, Hd, Wd).astype(src.dtype)

    v00 = gather(x0, y0)
    v01 = gather(x0 + 1, y0)
    v10 = gather(x0, y0 + 1)
    v11 = gather(x0 + 1, y0 + 1)
    return (v00 * (wx0 * wy0)[:, None] + v01 * (wx1 * wy0)[:, None]
            + v10 * (wx0 * wy1)[:, None] + v11 * (wx1 * wy1)[:, None])


# ----------------------------------------------------------------------------
# MAttFusion forward (semantics of the PyTorch module).
# ----------------------------------------------------------------------------
def matt_fusion_forward(x, record_len, pairwise_t_matrix, lidar_agent_indicator,
                        feature_dims, homo_attn, hetero_attn):
    _, C, H, W = x.shape
    B, L = pairwise_t_matrix.shape[:2]
    scale = 1.0 / math.sqrt(feature_dims)          # ScaledDotProductAttention scale

    # regroup (torch.tensor_split by record_len)
    offsets = np.cumsum([0] + list(record_len))
    split_x = [x[offsets[b]:offsets[b + 1]] for b in range(B)]
    split_lidar = [np.asarray(lidar_agent_indicator[offsets[b]:offsets[b + 1]])
                   for b in range(B)]

    out = []
    for b in range(B):
        N = int(record_len[b])
        lidar_agent = split_lidar[b]                               # int 0/1 vector
        t_matrix = pairwise_t_matrix[b, :N, :N]                    # (N, N, 2, 3)
        neighbor_feature = warp_affine_simple(split_x[b], t_matrix[0], (H, W))

        if lidar_agent.sum() != 0 and lidar_agent.sum() != N:
            # TODO(synk): literal torch semantics — lidar_agent is an int 0/1 tensor,
            # so tensor[lidar_agent] is integer fancy indexing (not a bool mask), and
            # torch.roll acts on dims (0, 1) = (C, H) of the (C, H, W) feature.
            lidar_feature = jnp.max(
                neighbor_feature[jnp.asarray(lidar_agent, dtype=jnp.int32)], axis=0)
            camera_feature = jnp.max(
                neighbor_feature[jnp.asarray(1 - lidar_agent, dtype=jnp.int32)], axis=0)
            q = lidar_feature.reshape(C, H * W)
            h = hetero_attn(q, camera_feature, scale).reshape(C, H, W)
            out.append(jnp.maximum(h, lidar_feature))
        else:
            q = neighbor_feature[0].reshape(C, H * W)              # ego query
            kv = neighbor_feature.reshape(N, C, H * W)
            h = homo_attn(q, kv, scale).reshape(C, H, W)
            out.append(h)
    return jnp.stack(out)


# ----------------------------------------------------------------------------
if __name__ == "__main__":
    key = jax.random.PRNGKey(0)
    B, L, C, H, W = 2, 3, 8, 16, 16
    record_len = [2, 3]
    total = sum(record_len)

    x = jax.random.normal(key, (total, C, H, W), dtype=jnp.float32)

    # identity normalized affine transforms (B, L, L, 2, 3)
    ident = jnp.array([[1.0, 0.0, 0.0], [0.0, 1.0, 0.0]], dtype=jnp.float32)
    pairwise_t_matrix = jnp.broadcast_to(ident, (B, L, L, 2, 3))

    # batch 0: all lidar  -> homogeneous self-attention branch
    # batch 1: mixed      -> heterogeneous (lidar query vs rolled camera) branch
    lidar_agent_indicator = np.array([1, 1, 1, 0, 1], dtype=np.int32)

    # --- full module forward: Pallas kernels vs pure-JAX reference ---
    out_pallas = matt_fusion_forward(
        x, record_len, pairwise_t_matrix, lidar_agent_indicator, feature_dims=C,
        homo_attn=ego_attention_pallas, hetero_attn=hetero_attention_pallas)
    jax.block_until_ready(out_pallas)
    out_ref = matt_fusion_forward(
        x, record_len, pairwise_t_matrix, lidar_agent_indicator, feature_dims=C,
        homo_attn=ego_attention_ref, hetero_attn=hetero_attention_ref)
    assert out_pallas.shape == (B, C, H, W)
    np.testing.assert_allclose(np.asarray(out_pallas), np.asarray(out_ref),
                               rtol=1e-4, atol=1e-4)

    # --- standalone kernel checks at larger P (exercises the larger lane tile) ---
    scale = 1.0 / math.sqrt(C)
    kq, kk = jax.random.split(jax.random.PRNGKey(1))
    Pbig, M = 2048, 3
    q32 = jax.random.normal(kq, (C, Pbig), dtype=jnp.float32)
    kv32 = jax.random.normal(kk, (M, C, Pbig), dtype=jnp.float32)
    np.testing.assert_allclose(
        np.asarray(ego_attention_pallas(q32, kv32, scale)),
        np.asarray(ego_attention_ref(q32, kv32, scale)), rtol=1e-4, atol=1e-4)

    # non-multiple-of-128 pixel count -> lane padding path
    np.testing.assert_allclose(
        np.asarray(ego_attention_pallas(q32[:, :300], kv32[:, :, :300], scale)),
        np.asarray(ego_attention_ref(q32[:, :300], kv32[:, :, :300], scale)),
        rtol=1e-4, atol=1e-4)

    # bf16 inputs travel over HBM at half the bytes; math stays f32 in-kernel.
    q16, kv16 = q32.astype(jnp.bfloat16), kv32.astype(jnp.bfloat16)
    out16 = ego_attention_pallas(q16, kv16, scale)
    assert out16.dtype == jnp.bfloat16
    np.testing.assert_allclose(
        np.asarray(out16, dtype=np.float32),
        np.asarray(ego_attention_ref(q16.astype(jnp.float32),
                                     kv16.astype(jnp.float32), scale)),
        rtol=2e-2, atol=2e-2)

    # heterogeneous kernel standalone check
    cam = jax.random.normal(jax.random.PRNGKey(2), (C, 16, 32), dtype=jnp.float32)
    ql = jax.random.normal(jax.random.PRNGKey(3), (C, 16 * 32), dtype=jnp.float32)
    np.testing.assert_allclose(
        np.asarray(hetero_attention_pallas(ql, cam, scale)),
        np.asarray(hetero_attention_ref(ql, cam, scale)), rtol=1e-4, atol=1e-4)

    print("KERNEL_OK")
</pallas_src>

<mosaic_0001>
module attributes {stable_mosaic.version = 11 : i64} {
  func.func @_ego_attn_kernel(%arg0: i32, %arg1: memref<8x128xf32, #tpu.memory_space<vmem>>, %arg2: memref<2x8x128xf32, #tpu.memory_space<vmem>>, %arg3: memref<8x128xf32, #tpu.memory_space<vmem>>) attributes {dimension_semantics = [#tpu.dimension_semantics<parallel>], iteration_bounds = array<i64: 2>, scalar_prefetch = 0 : i64, scratch_operands = 0 : i64, tpu.core_type = #tpu.core_type<tc>, window_params = [{transform_indices = @transform_0, window_bounds = array<i64: 8, 128>}, {transform_indices = @transform_1, window_bounds = array<i64: 2, 8, 128>}, {transform_indices = @transform_2, window_bounds = array<i64: 8, 128>}]} {
    %c0 = arith.constant 0 : index
    %c0_0 = arith.constant 0 : index
    %0 = vector.load %arg1[%c0, %c0_0] : memref<8x128xf32, #tpu.memory_space<vmem>>, vector<8x128xf32>
    %cst = arith.constant 0.353553385 : f32
    %1 = vector.broadcast %cst : f32 to vector<8x128xf32>
    %2 = arith.mulf %0, %1 : vector<8x128xf32>
    %c0_1 = arith.constant 0 : index
    %c0_2 = arith.constant 0 : index
    %c0_3 = arith.constant 0 : index
    %3 = vector.load %arg2[%c0_1, %c0_2, %c0_3] : memref<2x8x128xf32, #tpu.memory_space<vmem>>, vector<1x8x128xf32>
    %4 = vector.shape_cast %3 : vector<1x8x128xf32> to vector<8x128xf32>
    %5 = arith.mulf %2, %4 : vector<8x128xf32>
    %cst_4 = arith.constant dense<0.000000e+00> : vector<128xf32>
    %6 = vector.multi_reduction <add>, %5, %cst_4 [0] : vector<8x128xf32> to vector<128xf32>
    %7 = vector.shape_cast %6 : vector<128xf32> to vector<1x128xf32>
    %c1 = arith.constant 1 : index
    %c0_5 = arith.constant 0 : index
    %c0_6 = arith.constant 0 : index
    %8 = vector.load %arg2[%c1, %c0_5, %c0_6] : memref<2x8x128xf32, #tpu.memory_space<vmem>>, vector<1x8x128xf32>
    %9 = vector.shape_cast %8 : vector<1x8x128xf32> to vector<8x128xf32>
    %10 = arith.mulf %2, %9 : vector<8x128xf32>
    %cst_7 = arith.constant dense<0.000000e+00> : vector<128xf32>
    %11 = vector.multi_reduction <add>, %10, %cst_7 [0] : vector<8x128xf32> to vector<128xf32>
    %12 = vector.shape_cast %11 : vector<128xf32> to vector<1x128xf32>
    %13 = arith.maximumf %7, %12 : vector<1x128xf32>
    %14 = arith.subf %7, %13 : vector<1x128xf32>
    %15 = math.exp %14 : vector<1x128xf32>
    %16 = arith.subf %12, %13 : vector<1x128xf32>
    %17 = math.exp %16 : vector<1x128xf32>
    %18 = arith.addf %15, %17 : vector<1x128xf32>
    %19 = tpu.reciprocal %18 {approx = true} : vector<1x128xf32> -> vector<1x128xf32>
    %20 = arith.mulf %18, %19 : vector<1x128xf32>
    %cst_8 = arith.constant 2.000000e+00 : f32
    %21 = vector.broadcast %cst_8 : f32 to vector<1x128xf32>
    %22 = arith.subf %21, %20 : vector<1x128xf32>
    %23 = arith.mulf %19, %22 : vector<1x128xf32>
    %24 = arith.mulf %15, %23 : vector<1x128xf32>
    %25 = arith.mulf %17, %23 : vector<1x128xf32>
    %c0_9 = arith.constant 0 : index
    %c0_10 = arith.constant 0 : index
    %c0_11 = arith.constant 0 : index
    %26 = vector.load %arg2[%c0_9, %c0_10, %c0_11] : memref<2x8x128xf32, #tpu.memory_space<vmem>>, vector<1x8x128xf32>
    %27 = vector.shape_cast %26 : vector<1x8x128xf32> to vector<8x128xf32>
    %28 = vector.broadcast %24 : vector<1x128xf32> to vector<8x128xf32>
    %29 = arith.mulf %27, %28 : vector<8x128xf32>
    %c1_12 = arith.constant 1 : index
    %c0_13 = arith.constant 0 : index
    %c0_14 = arith.constant 0 : index
    %30 = vector.load %arg2[%c1_12, %c0_13, %c0_14] : memref<2x8x128xf32, #tpu.memory_space<vmem>>, vector<1x8x128xf32>
    %31 = vector.shape_cast %30 : vector<1x8x128xf32> to vector<8x128xf32>
    %32 = vector.broadcast %25 : vector<1x128xf32> to vector<8x128xf32>
    %33 = arith.mulf %31, %32 : vector<8x128xf32>
    %34 = arith.addf %29, %33 : vector<8x128xf32>
    %c0_15 = arith.constant 0 : index
    %c0_16 = arith.constant 0 : index
    %35 = vector.load %arg3[%c0_15, %c0_16] : memref<8x128xf32, #tpu.memory_space<vmem>>, vector<8x128xf32>
    tpu.vector_store %arg3[%c0_15, %c0_16], %34 {strides = array<i32>} : memref<8x128xf32, #tpu.memory_space<vmem>>, vector<8x128xf32>,
    return
  }
  func.func @transform_0(%arg0: i32) -> (i32, i32) {
    %c0_i32 = arith.constant 0 : i32
    %c0_i32_0 = arith.constant 0 : i32
    return %c0_i32, %arg0 : i32, i32
  }
  func.func @transform_1(%arg0: i32) -> (i32, i32, i32) {
    %c0_i32 = arith.constant 0 : i32
    %c0_i32_0 = arith.constant 0 : i32
    %c0_i32_1 = arith.constant 0 : i32
    return %c0_i32, %c0_i32_0, %arg0 : i32, i32, i32
  }
  func.func @transform_2(%arg0: i32) -> (i32, i32) {
    %c0_i32 = arith.constant 0 : i32
    %c0_i32_0 = arith.constant 0 : i32
    return %c0_i32, %arg0 : i32, i32
  }
}

</mosaic_0001>

<bundles_post_ra>
// kernel: tpu_custom_call.1
= control target key start
LH: loop header
LB: loop body
LE: loop exit
PB: predicated region body
PF: predicated region fallthrough
CT: control target
= control target key end

     0   :  { %7 = vsyncpa [#allocation3], 0  ;;  %s788_s0 = inlined_call_operand.hbm [shape: f32[8,256], index: 0, kind: input, shape index: {}]   ;;  %s789_s1 = inlined_call_operand.hbm [shape: f32[2,8,256], index: 1, kind: input, shape index: {}]   ;;  %s790_s2 = inlined_call_operand.hbm [shape: f32[8,256], index: 2, kind: output, shape index: {}]  }
   0x1   :  { %9 = vsyncpa [#allocation3 + $0x1], 0 }
   0x2   :  { %10 = vsyncpa [#allocation6], 0 }
   0x3   :  { %12 = vsyncpa [#allocation6 + $0x1], 0 }
   0x4   :  { %13 = vsyncpa [#allocation4], 0 }
   0x5   :  { %15 = vsyncpa [#allocation4 + $0x1], 0  ;;  %s571_s9 = smov 0   ;;  %s573_s10 = smov 0  }
   0x6   :  { %s575_s11 = smov 0   ;;  %s577_s12 = smov 0  }
   0x7 LB: > { %s592_s13 = sadd.s32 4294967295, %s548_s12   ;;  %s342_s14 = sadd.s32 4294967294, %s548_s12   ;;  %s548_s12 = sphi %s577_s12, %s806_s12   ;;  %s544_s11 = sphi %s575_s11, %s805_s11   ;;  %s540_s10 = sphi %s573_s10, %s804_s10   ;;  %s536_s9 = sphi %s571_s9, %s803_s9  }
   0x8   : > { %s596_s15 = sadd.s32 1, %s548_s12   ;;  %s28_s16 = sadd.s32 1, %s544_s11 }
   0x9   : > { %s25_s17 = ssub.s32 %s548_s12, %s596_s15  ;;  %p35_p0 = scmp.ne.s32.totalorder %s544_s11, %s540_s10 }
   0xa   : > { %p26_p1 = scmp.eq.s32.totalorder %s25_s17, 0  ;;  %p36_p2 = scmp.eq.s32.totalorder %s548_s12, 0 }
   0xb   : > { %p41_p3 = scmp.ne.s32.totalorder %s540_s10, %s536_s9  ;;  %p42_p4 = scmp.eq.s32.totalorder %s592_s13, 0 }
   0xc   : > { %s608_s18 = scalar_select %p26_p1, %s544_s11, %s28_s16  }
   0xd   : > { %p610_p5 = por %p36_p2, %p35_p0  ;;  %p614_p6 = por %p42_p4, %p41_p3 }
   0xe   : > { %p91_p7 = scmp.eq.s32.totalorder %s592_s13, 1  ;;  %p97_p8 = scmp.eq.s32.totalorder %s342_s14, 1 }
   0xf   : > { %s794_s20 = scalar_select %p614_p6, 1, 0 }
  0x10   : > { %p375_p10 = scmp.lt.s32.totalorder %s548_s12, 2  ;;  %p621_p11 = por %p91_p7, %p35_p0 }
  0x11   : > { %p625_p12 = por %p97_p8, %p41_p3  ;;  %s630_s23 = sand.u32 1, %s544_s11  }
  0x12   : > { %s795_s21 = scalar_select %p621_p11, 1, 0 }
  0x13   : > { %s796_s22 = scalar_select %p625_p12, 1, 0 }
  0x14   : > { %s346_s24 = sshll.u32 %s548_s12, 7  ;;  %s345_s25 = sshll.u32 %s630_s23, 3 }
  0x15   : > { %s639_s28 = scalar_lea.hbm %s788_s0, %s346_s24  ;;  %s121_s29 = scalar_lea.vmem [#allocation2], %s345_s25 }
  0x16   : > { %s128_s30 = sshll.u32 %s121_s29, 4  ;;  %p643_p13 = pnand %p375_p10, %p610_p5  ;;  %s647_s30 = int_to_ptr.vmem [resolvable:$true] %s128_s30 }
  0x17   : > { %s347_s4 = sshll.u32 %s630_s23, 4  ;;  %s118_s5 = scalar_lea.sflag [#allocation3], %s630_s23 }
  0x18   : > { %s418_s6 = scalar_lea.hbm %s639_s28, 128  ;;  %p420_p1 = pneg %p643_p13 }
  0x19   : > { %p419_p0 = scmp.ne.s32.totalorder %s639_s28, %s418_s6  ;;  %s423_s14 = scalar_lea.hbm %s788_s0, 256 }
  0x1a   : > { %p424_p4 = scmp.lt.u32.totalorder %s639_s28, %s788_s0  ;;  %p425_p5 = scmp.lt.u32.totalorder %s423_s14, %s418_s6 }
  0x1b   : > { %p421_p2 = pnand %p420_p1, %p419_p0  ;;  %p427_p8 = scmp.lt.u32.totalorder %s418_s6, %s639_s28 }
  0x1c   : > { %p426_p7 = por %p425_p5, %p424_p4 }
  0x1d   : > { %p422_p3 = pneg %p421_p2 }
  0x1e   : > { %p428_p10 = por %p427_p8, %p426_p7 }
  0x20   : > { %p429_p9 = pnand %p428_p10, %p422_p3 }
  0x22   : > { %432 = shalt.err (!%p429_p9)
}
  0x23   : > { %s433_s19 = scalar_lea.vmem %s647_s30, 128  ;;  %s550_s25 = smov [#allocation2]  }
  0x24   : > { %p434_p0 = scmp.ne.s32.totalorder %s647_s30, %s433_s19  ;;  %s438_s26 = sshll.u32 %s550_s25, 4  ;;  %s439_s26 = int_to_ptr.vmem [resolvable:$false] %s438_s26 }
  0x25   : > { %s440_s27 = scalar_lea.vmem %s439_s26, 256  ;;  %p441_p11 = scmp.lt.s32.totalorder %s647_s30, %s439_s26 }
  0x26   : > { %p436_p2 = pnand %p434_p0, %p420_p1  ;;  %p442_p4 = scmp.lt.s32.totalorder %s440_s27, %s433_s19 }
  0x28   : > { %p437_p12 = pneg %p436_p2  ;;  %p443_p5 = por %p442_p4, %p441_p11 }
  0x2a   : > { %p444_p7 = pnand %p443_p5, %p437_p12 }
  0x2c   : > { %447 = shalt.err (!%p444_p7)
}
  0x2d   : > { %367 = dma.hbm_to_vmem [thread:$0]  (!%p643_p13), %s639_s28, 128, %s647_s30, %s118_s5  }
  0x2e   : > { %s681_s7 = scalar_lea.hbm %s789_s1, %s346_s24  ;;  %p349_p9 = scmp.ge.s32.totalorder %s548_s12, 1 }
  0x2f   : > { %p153_p11 = scmp.lt.s32.totalorder %s548_s12, 3  ;;  %s139_s8 = scalar_lea.vmem [#allocation5], %s347_s4 }
  0x30   : > { %s145_s14 = sshll.u32 %s139_s8, 4  ;;  %s136_s28 = scalar_lea.sflag [#allocation6], %s630_s23  ;;  %s691_s14 = int_to_ptr.vmem [resolvable:$true] %s145_s14 }
  0x31   : > { %p687_p12 = pnand %p349_p9, %p153_p11  ;;  %s448_s30 = scalar_lea.hbm %s681_s7, 256 }
  0x32   : > { %p449_p3 = scmp.ne.s32.totalorder %s681_s7, %s448_s30  ;;  %s453_s17 = scalar_lea.hbm %s789_s1, 512 }
  0x33   : > { %p454_p0 = scmp.lt.u32.totalorder %s681_s7, %s789_s1  ;;  %p455_p2 = scmp.lt.u32.totalorder %s453_s17, %s448_s30 }
  0x34   : > { %p451_p8 = pnand %p449_p3, %p420_p1  ;;  %p457_p5 = scmp.lt.u32.totalorder %s448_s30, %s681_s7 }
  0x35   : > { %p456_p4 = por %p455_p2, %p454_p0 }
  0x36   : > { %p452_p10 = pneg %p451_p8 }
  0x37   : > { %p458_p7 = por %p457_p5, %p456_p4 }
  0x39   : > { %p459_p9 = pnand %p458_p7, %p452_p10 }
  0x3b   : > { %462 = shalt.err (!%p459_p9)
}
  0x3c   : > { %s463_s25 = scalar_lea.vmem %s691_s14, 256  ;;  %s551_s26 = smov [#allocation5]  }
  0x3d   : > { %p464_p11 = scmp.ne.s32.totalorder %s691_s14, %s463_s25  ;;  %s468_s27 = sshll.u32 %s551_s26, 4  ;;  %s469_s27 = int_to_ptr.vmem [resolvable:$false] %s468_s27 }
  0x3e   : > { %s470_s29 = scalar_lea.vmem %s469_s27, 512  ;;  %p471_p6 = scmp.lt.s32.totalorder %s691_s14, %s469_s27 }
  0x3f   : > { %p466_p3 = pnand %p464_p11, %p420_p1  ;;  %p472_p0 = scmp.lt.s32.totalorder %s470_s29, %s463_s25 }
  0x41   : > { %p467_p8 = pneg %p466_p3  ;;  %p473_p2 = por %p472_p0, %p471_p6 }
  0x43   : > { %p474_p4 = pnand %p473_p2, %p467_p8 }
  0x45   : > { %477 = shalt.err (!%p474_p4)
}
  0x46   : > { %s552_s6 = smov 256   ;;  %s553_s8 = smov 128  }
  0x47   : > { %s554_s30 = smov 8   ;;  %157 = sbr.rel (%p687_p12) target bundleno = 156 (0x9c), region = 28 }
  0x48   : > { %370 = dma.hbm_to_vmem [thread:$0]  (!%p643_p13), %s681_s7, 256, %s691_s14, %s136_s28, %s552_s6, %s553_s8, %s554_s30  }
  0x49   : > { %s722_s24 = sand.u32 (!%p687_p12), 1, %s540_s10   ;;  %p799_p6 = scmp.ne.s32.totalorder (!%p687_p12), %s794_s20, 0 }
  0x4a   : > { %s350_s5 = sshll.u32 (!%p687_p12), %s722_s24, 3  ;;  %s160_s17 = scalar_lea.sflag (!%p687_p12), [#allocation3], %s722_s24 }
  0x4b   : > { %s163_s19 = scalar_lea.vmem (!%p687_p12), [#allocation2], %s350_s5 }
  0x4e   : > { %523 = dma.done.wait (%p799_p6), %s160_s17, 128  }
  0x4f   : > { %525 = vsyncadd (%p799_p6), %s160_s17, 4294967168  ;;  %s351_s23 = sshll.u32 %s722_s24, 4  ;;  %s169_s3 = scalar_lea.sflag [#allocation6], %s722_s24 }
  0x50   : > { %s172_s7 = scalar_lea.vmem [#allocation5], %s351_s23 }
  0x51   : > { %527 = dma.done.wait (%p799_p6), %s169_s3, 256  }
  0x52   : > { %529 = vsyncadd (%p799_p6), %s169_s3, 4294967040  ;;  %v198_v0 = vld [vmem:[%s163_s19] sm:$0xff]  ;;  %v200_v1 = vld [vmem:[%s172_s7] sm:$0xff]  ;;  %s197_s20 = scalar_lea.vmem [#allocation7], %s350_s5  ;;  %s355_s16 = sshll.u32 %s592_s13, 7 }
  0x53   : > { %v353_v2 = vld [vmem:[%s172_s7 + $0x8] sm:$0xff]  ;;  %v199_v3 = vmul.f32 0.35355338, %v198_v0  ;;  %s249_s14 = sshll.u32 %s197_s20, 4  ;;  %s746_s25 = scalar_lea.hbm %s790_s2, %s355_s16  ;;  %s741_s14 = int_to_ptr.vmem [resolvable:$true] %s249_s14 }
  0x54   : > { %s236_s26 = scalar_lea.sflag [#allocation4], %s722_s24  ;;  %s478_s27 = scalar_lea.vmem %s741_s14, 128 }
  0x55   : > { %v201_v4 = vmul.f32 %v200_v1, %v199_v3  ;;  %v210_v5 = vmul.f32 %v353_v2, %v199_v3  ;;  %p479_p13 = scmp.ne.s32.totalorder %s741_s14, %s478_s27  ;;  %p800_p1 = scmp.ne.s32.totalorder %s795_s21, 0 }
  0x56   : > { %s555_s13 = smov [#allocation7]  }
  0x57   : > { %v202_v6 = vrot.slane %v201_v4, 4  ;;  %v211_v7 = vrot.slane %v210_v5, 4  ;;  %p480_p12 = pnand %p479_p13, %p800_p1  ;;  %s482_s29 = sshll.u32 %s555_s13, 4  ;;  %s483_s29 = int_to_ptr.vmem [resolvable:$false] %s482_s29 }
  0x58   : > { %s484_s6 = scalar_lea.vmem %s483_s29, 256  ;;  %p485_p5 = scmp.lt.s32.totalorder %s741_s14, %s483_s29 }
  0x59   : > { %v203_v8 = vadd.f32 %v202_v6, %v201_v4  ;;  %v212_v9 = vadd.f32 %v211_v7, %v210_v5  ;;  %p481_p10 = pneg %p480_p12  ;;  %p486_p7 = scmp.lt.s32.totalorder %s484_s6, %s478_s27 }
  0x5b   : > { %v204_v10 = vrot.slane %v203_v8, 2  ;;  %v213_v11 = vrot.slane %v212_v9, 2  ;;  %p487_p9 = por %p486_p7, %p485_p5 }
  0x5d   : > { %v205_v12 = vadd.f32 %v204_v10, %v203_v8  ;;  %v214_v13 = vadd.f32 %v213_v11, %v212_v9  ;;  %p488_p11 = pnand %p487_p9, %p481_p10 }
  0x5f   : > { %v206_v14 = vrot.slane %v205_v12, 1  ;;  %v215_v15 = vrot.slane %v214_v13, 1 }
  0x61   : > { %v207_v16 = vadd.f32 %v206_v14, %v205_v12  ;;  %v216_v17 = vadd.f32 %v215_v15, %v214_v13 }
  0x63   : > { %v217_v18 = vmax.f32 %v207_v16, %v216_v17 }
  0x65   : > { %v218_v19 = vsub.f32 %v207_v16, %v217_v18  ;;  %v221_v20 = vsub.f32 %v216_v17, %v217_v18 }
  0x67   : > { %v219_v21 = vmul.f32 1.442695, %v218_v19  ;;  %v222_v22 = vmul.f32 1.442695, %v221_v20 }
  0x69   : > { %412 = vpow2.f32 %v219_v21 }
  0x6a   : > { %414 = vpow2.f32 %v222_v22 }
  0x73   : > { %v413_v23 = vpop.eup %412 }
  0x74   : > { %v415_v24 = vpop.eup %414 }
  0x75   : > { %v224_v25 = vadd.f32 %v415_v24, %v413_v23 }
  0x77   : > { %416 = vrcp.f32 %v224_v25 }
  0x81   : > { %v417_v26 = vpop.eup %416 }
  0x82   : > { %v226_v27 = vmul.f32 %v417_v26, %v224_v25 }
  0x84   : > { %v227_v28 = vsub.f32 2.0, %v226_v27 }
  0x86   : > { %v228_v29 = vmul.f32 %v417_v26, %v227_v28 }
  0x88   : > { %v229_v30 = vmul.f32 %v413_v23, %v228_v29  ;;  %v230_v31 = vmul.f32 %v415_v24, %v228_v29 }
  0x8a   : > { %v231_v32 = vmul.f32 %v229_v30, %v200_v1  ;;  %v232_v33 = vmul.f32 %v353_v2, %v230_v31 }
  0x8c   : > { %v233_v34 = vadd.f32 %v232_v33, %v231_v32 }
  0x8e   : > { %234 = vst [vmem:[%s197_s20] sm:$0xff] %v233_v34 }
  0x8f   : > { %491 = shalt.err (!%p488_p11)
}
  0x90   : > { %s492_s8 = scalar_lea.hbm %s746_s25, 128  ;;  %s496_s5 = scalar_lea.hbm %s790_s2, 256 }
  0x91   : > { %p493_p3 = scmp.ne.s32.totalorder %s746_s25, %s492_s8  ;;  %p497_p2 = scmp.lt.u32.totalorder %s746_s25, %s790_s2 }
  0x92   : > { %p498_p4 = scmp.lt.u32.totalorder %s496_s5, %s492_s8  ;;  %p500_p13 = scmp.lt.u32.totalorder %s492_s8, %s746_s25 }
  0x93   : > { %p494_p8 = pnand %p493_p3, %p800_p1 }
  0x94   : > { %p499_p6 = por %p498_p4, %p497_p2 }
  0x95   : > { %p495_p0 = pneg %p494_p8 }
  0x96   : > { %p501_p12 = por %p500_p13, %p499_p6 }
  0x98   : > { %p502_p10 = pnand %p501_p12, %p495_p0 }
  0x9a   : > { %505 = shalt.err (!%p502_p10)
}
  0x9b   : > { %362 = dma.vmem_to_hbm [thread:$0]  (%p800_p1), %s741_s14, 128, %s746_s25, %s236_s26  }
  0x9c PF: > { %s261_s23 = sand.u32 1, %s536_s9   ;;  %p801_p5 = scmp.ne.s32.totalorder %s796_s22, 0 }
  0x9d   : > { %p802_p7 = scmp.ge.s32.totalorder %s548_s12, 2  ;;  %s262_s3 = scalar_lea.sflag [#allocation4], %s261_s23 }
  0x9f   : > { %p372_p9 = pnand %p802_p7, %p801_p5 }
  0xa1   : > { %531 = dma.done.wait (!%p372_p9), %s262_s3, 128  }
  0xa2   : > { %533 = vsyncadd (!%p372_p9), %s262_s3, 4294967168  ;;  %p18_p11 = scmp.ge.s32.totalorder %s596_s15, 4   ;;  %s803_s9 = smov %s540_s10 }
  0xa3   : > { %s804_s10 = smov %s544_s11  ;;  %s805_s11 = smov %s608_s18 }
  0xa4   : > { %s806_s12 = smov %s596_s15  ;;  %20 = sbr.rel (!%p18_p11) target bundleno = 7 (0x7), region = 87 }
  0xab   :  { %267 = vsyncpa [#allocation3], 1 }
  0xac   :  { %269 = vsyncpa [#allocation3 + $0x1], 1 }
  0xad   :  { %270 = vsyncpa [#allocation6], 1 }
  0xae   :  { %272 = vsyncpa [#allocation6 + $0x1], 1 }
  0xaf   :  { %273 = vsyncpa [#allocation4], 1 }
  0xb0   :  { %275 = vsyncpa [#allocation4 + $0x1], 1 }

</bundles_post_ra>
